<compile_context>
chip_gen: v6e
topology: v6e:2x2x1
jax: 0.10.0
libtpu: 0.0.40
codegen_flags: <defaults>
</compile_context>

<pallas_src>
import jax
import jax.numpy as jnp
from jax.experimental import pallas as pl
from jax.experimental.pallas import tpu as pltpu

_VMEM_LIMIT = 32 * 1024 * 1024   # explicit scoped-VMEM budget, safe on v5e/v6e/v7x

_TM = 512      # GEMM row tile (N*OH*OW axis)
_TN = 256      # GEMM output-channel tile
_TK = 512      # GEMM contraction tile
_TR = 1024     # row tile for elementwise / reduction kernels


def _round_up(x, m):
    return ((x + m - 1) // m) * m


# ------------------------------------------------------------------
# Pallas kernels
# ------------------------------------------------------------------

def _make_gemm_kernel(act):
    """Tiled im2col-conv GEMM: bf16 MXU matmul -> f32 accumulator -> bias + act."""
    def kernel(a_ref, w_ref, b_ref, o_ref, acc_ref):
        k = pl.program_id(2)

        @pl.when(k == 0)
        def _():
            acc_ref[...] = jnp.zeros_like(acc_ref)

        acc_ref[...] += jnp.dot(a_ref[...], w_ref[...],
                                preferred_element_type=jnp.float32)

        @pl.when(k == pl.num_programs(2) - 1)
        def _():
            y = acc_ref[...] + b_ref[...]
            if act == "lrelu":
                y = jnp.where(y > 0, y, 0.2 * y)      # LeakyReLU(0.2)
            elif act == "relu":
                y = jnp.maximum(y, 0.0)
            o_ref[...] = y
    return kernel


def _make_bn_stats_kernel(m_real):
    """Per-channel sum / sum-of-squares over the (masked) row axis, accumulated
    across the M grid axis (marked "arbitrary")."""
    def kernel(y_ref, s_ref, q_ref):
        i = pl.program_id(0)

        @pl.when(i == 0)
        def _():
            s_ref[...] = jnp.zeros_like(s_ref)
            q_ref[...] = jnp.zeros_like(q_ref)

        y = y_ref[...]
        rows = i * y.shape[0] + jax.lax.broadcasted_iota(jnp.int32, y.shape, 0)
        ym = jnp.where(rows < m_real, y, 0.0)
        s_ref[...] += jnp.sum(ym, axis=0, keepdims=True)
        q_ref[...] += jnp.sum(ym * ym, axis=0, keepdims=True)
    return kernel


def _make_scale_shift_act_kernel(act):
    """y * scale + shift followed by activation (BatchNorm apply pass)."""
    def kernel(y_ref, s_ref, t_ref, o_ref):
        y = y_ref[...] * s_ref[...] + t_ref[...]
        if act == "lrelu":
            y = jnp.where(y > 0, y, 0.2 * y)
        elif act == "relu":
            y = jnp.maximum(y, 0.0)
        o_ref[...] = y
    return kernel


def _make_masked_sum_kernel(elem_fn, n_in):
    """sum over all elements of elem_fn(*inputs) * mask, tiled over a 1-D row grid."""
    def kernel(*refs):
        x_refs = refs[:n_in]
        m_ref = refs[n_in]
        o_ref = refs[n_in + 1]
        i = pl.program_id(0)

        @pl.when(i == 0)
        def _():
            o_ref[...] = jnp.zeros_like(o_ref)

        v = elem_fn(*[r[...] for r in x_refs]) * m_ref[...]
        o_ref[...] += jnp.sum(v)
    return kernel


def _lpips_kernel(f1_ref, f2_ref, w_ref, o_ref):
    """LPIPS-style distance: channel-unit-normalize, squared diff, per-channel
    weighting, global sum.  Zero-padded rows/channels contribute exactly 0."""
    i = pl.program_id(0)

    @pl.when(i == 0)
    def _():
        o_ref[...] = jnp.zeros_like(o_ref)

    f1 = f1_ref[...]
    f2 = f2_ref[...]
    n1 = f1 * jax.lax.rsqrt(jnp.sum(f1 * f1, axis=1, keepdims=True) + 1e-10)
    n2 = f2 * jax.lax.rsqrt(jnp.sum(f2 * f2, axis=1, keepdims=True) + 1e-10)
    d = (n1 - n2) ** 2 * w_ref[...]
    o_ref[...] += jnp.sum(d)


# ------------------------------------------------------------------
# Pallas-call wrappers
# ------------------------------------------------------------------

def _conv_gemm(patches, wmat, bias, act):
    """(M, K) x (K, OC) GEMM + bias + optional activation, tiled for the MXU."""
    m, k = patches.shape
    _, oc = wmat.shape

    tm = min(_TM, _round_up(m, 16))
    m_pad = _round_up(m, tm)
    if k > _TK:
        tk = _TK
        k_pad = _round_up(k, tk)
    else:
        tk = k
        k_pad = k
    if oc % _TN == 0:
        tn = _TN
    elif oc % 128 == 0:
        tn = 128
    else:
        tn = oc            # full-dim block (e.g. OC=64 first PatchGAN layer)

    a = patches.astype(jnp.bfloat16)
    w = wmat.astype(jnp.bfloat16)
    if m_pad != m or k_pad != k:
        a = jnp.pad(a, ((0, m_pad - m), (0, k_pad - k)))
    if k_pad != k:
        w = jnp.pad(w, ((0, k_pad - k), (0, 0)))
    b = bias.reshape(1, oc).astype(jnp.float32)

    out = pl.pallas_call(
        _make_gemm_kernel(act),
        out_shape=jax.ShapeDtypeStruct((m_pad, oc), jnp.float32),
        grid_spec=pltpu.PrefetchScalarGridSpec(
            num_scalar_prefetch=0,
            grid=(m_pad // tm, oc // tn, k_pad // tk),
            in_specs=[
                pl.BlockSpec((tm, tk), lambda i, j, kk: (i, kk)),
                pl.BlockSpec((tk, tn), lambda i, j, kk: (kk, j)),
                pl.BlockSpec((1, tn), lambda i, j, kk: (0, j)),
            ],
            out_specs=pl.BlockSpec((tm, tn), lambda i, j, kk: (i, j)),
            scratch_shapes=[pltpu.VMEM((tm, tn), jnp.float32)],
        ),
        compiler_params=pltpu.CompilerParams(
            dimension_semantics=("parallel", "parallel", "arbitrary"),
            vmem_limit_bytes=_VMEM_LIMIT,
        ),
    )(a, w, b)
    return out[:m] if m_pad != m else out


def _batchnorm_act(y, gamma, beta, act):
    """PyTorch BatchNorm2d (training mode, batch stats over N*OH*OW rows) + act,
    restructured as tiled stats pass + tiny JAX math + tiled apply pass."""
    m, oc = y.shape
    tm = min(_TR, _round_up(m, 8))
    m_pad = _round_up(m, tm)
    y_p = jnp.pad(y, ((0, m_pad - m), (0, 0))) if m_pad != m else y

    s, q = pl.pallas_call(
        _make_bn_stats_kernel(m),
        out_shape=(jax.ShapeDtypeStruct((1, oc), jnp.float32),
                   jax.ShapeDtypeStruct((1, oc), jnp.float32)),
        grid_spec=pltpu.PrefetchScalarGridSpec(
            num_scalar_prefetch=0,
            grid=(m_pad // tm,),
            in_specs=[pl.BlockSpec((tm, oc), lambda i: (i, 0))],
            out_specs=[pl.BlockSpec((1, oc), lambda i: (0, 0)),
                       pl.BlockSpec((1, oc), lambda i: (0, 0))],
        ),
        compiler_params=pltpu.CompilerParams(
            dimension_semantics=("arbitrary",),
            vmem_limit_bytes=_VMEM_LIMIT,
        ),
    )(y_p)

    mean = s / m
    var = jnp.maximum(q / m - mean * mean, 0.0)          # biased variance (training)
    scale = gamma.reshape(1, oc) * jax.lax.rsqrt(var + 1e-5)
    shift = beta.reshape(1, oc) - mean * scale
    # TODO(synk): running_mean / running_var are not tracked (forward-only).

    out = pl.pallas_call(
        _make_scale_shift_act_kernel(act),
        out_shape=jax.ShapeDtypeStruct((m_pad, oc), jnp.float32),
        grid_spec=pltpu.PrefetchScalarGridSpec(
            num_scalar_prefetch=0,
            grid=(m_pad // tm,),
            in_specs=[pl.BlockSpec((tm, oc), lambda i: (i, 0)),
                      pl.BlockSpec((1, oc), lambda i: (0, 0)),
                      pl.BlockSpec((1, oc), lambda i: (0, 0))],
            out_specs=pl.BlockSpec((tm, oc), lambda i: (i, 0)),
        ),
        compiler_params=pltpu.CompilerParams(
            dimension_semantics=("parallel",),
            vmem_limit_bytes=_VMEM_LIMIT,
        ),
    )(y_p, scale, shift)
    return out[:m] if m_pad != m else out


def _masked_reduce_sum(elem_fn, arrays):
    """Global sum of elem_fn(*arrays) via a tiled, lane-dense Pallas reduction.
    Returns (sum, element_count)."""
    flats = [a.reshape(-1).astype(jnp.float32) for a in arrays]
    n = flats[0].shape[0]
    cols = 128
    rows = max(1, -(-n // cols))
    tr = min(_TR, _round_up(rows, 8))
    rows_pad = _round_up(rows, tr)
    total = rows_pad * cols
    padded = [jnp.pad(f, (0, total - n)).reshape(rows_pad, cols) for f in flats]
    mask = jnp.pad(jnp.ones((n,), jnp.float32), (0, total - n)).reshape(rows_pad, cols)

    out = pl.pallas_call(
        _make_masked_sum_kernel(elem_fn, len(arrays)),
        out_shape=jax.ShapeDtypeStruct((1, 1), jnp.float32),
        grid_spec=pltpu.PrefetchScalarGridSpec(
            num_scalar_prefetch=0,
            grid=(rows_pad // tr,),
            in_specs=[pl.BlockSpec((tr, cols), lambda i: (i, 0))] * (len(arrays) + 1),
            out_specs=pl.BlockSpec((1, 1), lambda i: (0, 0)),
        ),
        compiler_params=pltpu.CompilerParams(
            dimension_semantics=("arbitrary",),
            vmem_limit_bytes=_VMEM_LIMIT,
        ),
    )(*padded, mask)
    return out[0, 0], n


def _lpips_distance_sum(f1, f2, lin_w):
    m, c = f1.shape                      # c is 128 (zero-padded channels), lane-dense
    tr = min(_TR, _round_up(m, 8))
    m_pad = _round_up(m, tr)
    if m_pad != m:
        f1 = jnp.pad(f1, ((0, m_pad - m), (0, 0)))
        f2 = jnp.pad(f2, ((0, m_pad - m), (0, 0)))
    out = pl.pallas_call(
        _lpips_kernel,
        out_shape=jax.ShapeDtypeStruct((1, 1), jnp.float32),
        grid_spec=pltpu.PrefetchScalarGridSpec(
            num_scalar_prefetch=0,
            grid=(m_pad // tr,),
            in_specs=[pl.BlockSpec((tr, c), lambda i: (i, 0)),
                      pl.BlockSpec((tr, c), lambda i: (i, 0)),
                      pl.BlockSpec((1, c), lambda i: (0, 0))],
            out_specs=pl.BlockSpec((1, 1), lambda i: (0, 0)),
        ),
        compiler_params=pltpu.CompilerParams(
            dimension_semantics=("arbitrary",),
            vmem_limit_bytes=_VMEM_LIMIT,
        ),
    )(f1, f2, lin_w.reshape(1, c))
    return out[0, 0]


# ------------------------------------------------------------------
# Elementwise loss functions (traced inside the reduction kernels)
# ------------------------------------------------------------------

def _elem_identity(x):
    return x


def _elem_bce(x, y):
    # numerically-stable BCE-with-logits: max(x,0) - x*y + log(1 + exp(-|x|))
    return jnp.maximum(x, 0.0) - x * y + jnp.log1p(jnp.exp(-jnp.abs(x)))


def _elem_hinge_real(x):
    return jnp.maximum(1.0 - x, 0.0)


def _elem_hinge_fake(x):
    return jnp.maximum(1.0 + x, 0.0)


# ------------------------------------------------------------------
# Glue
# ------------------------------------------------------------------

def _im2col_nhwc(x, kh, kw, stride, pad):
    # TODO(synk): patches are still materialized in HBM (~kh*kw input expansion);
    # a direct shifted-window accumulation with manual DMA would remove this.
    n, h, w, c = x.shape
    xp = jnp.pad(x, ((0, 0), (pad, pad), (pad, pad), (0, 0)))
    oh = (h + 2 * pad - kh) // stride + 1
    ow = (w + 2 * pad - kw) // stride + 1
    ih = (jnp.arange(oh) * stride)[:, None] + jnp.arange(kh)[None, :]    # (oh, kh)
    iw = (jnp.arange(ow) * stride)[:, None] + jnp.arange(kw)[None, :]    # (ow, kw)
    patches = xp[:, ih[:, None, :, None], iw[None, :, None, :], :]       # (n,oh,ow,kh,kw,c)
    return patches.reshape(n * oh * ow, kh * kw * c), oh, ow


_IMAGENET_MEAN = jnp.array([0.485, 0.456, 0.406], jnp.float32).reshape(1, 3, 1, 1)
_IMAGENET_STD = jnp.array([0.229, 0.224, 0.225], jnp.float32).reshape(1, 3, 1, 1)


def imnet_to_lpips(x):
    # undo ImageNet normalization, rescale to [-1, 1] (LPIPS input range)
    return (x * _IMAGENET_STD + _IMAGENET_MEAN) * 2.0 - 1.0


def adopt_weight(weight, global_step, threshold=0, value=0.0):
    if global_step < threshold:
        weight = value
    return weight


# ------------------------------------------------------------------
# LPIPSWithDiscriminator
# ------------------------------------------------------------------

class LPIPSWithDiscriminatorPallas:
    def __init__(self, balanced=True, total_norm=0.0, disc_weight=1.0, percep_weight=1.0,
                 detect_weight=1.0, decode_weight=0.0, disc_start=0, disc_num_layers=3,
                 disc_in_channels=3, disc_loss='hinge', seed=42):
        assert disc_loss in ['hinge', 'vanilla']
        if disc_loss != 'hinge':
            # TODO(synk): vanilla (BCE) discriminator loss branch not implemented.
            raise NotImplementedError("only hinge disc_loss is implemented")
        self.balanced = balanced
        self.total_norm = total_norm
        self.percep_weight = percep_weight
        self.detect_weight = detect_weight
        self.disc_weight = disc_weight
        self.decode_weight = decode_weight
        self.discriminator_iter_start = disc_start

        key = jax.random.PRNGKey(seed)

        # ---- NLayerDiscriminator (PatchGAN), weights_init semantics ----
        ndf = 64
        cfgs = [(disc_in_channels, ndf, 2, False)]        # (in_ch, out_ch, stride, use_bn)
        nf_mult = 1
        for nl in range(1, disc_num_layers):
            prev, nf_mult = nf_mult, min(2 ** nl, 8)
            cfgs.append((ndf * prev, ndf * nf_mult, 2, True))
        prev, nf_mult = nf_mult, min(2 ** disc_num_layers, 8)
        cfgs.append((ndf * prev, ndf * nf_mult, 1, True))
        cfgs.append((ndf * nf_mult, 1, 1, False))

        self.disc_layers = []
        n_layers = len(cfgs)
        for li, (ic, oc, stride, use_bn) in enumerate(cfgs):
            key, kw_, kg_ = jax.random.split(key, 3)
            w = 0.02 * jax.random.normal(kw_, (oc, ic, 4, 4), jnp.float32)       # N(0, 0.02)
            b = jnp.zeros((oc,), jnp.float32)
            gamma = 1.0 + 0.02 * jax.random.normal(kg_, (oc,), jnp.float32)      # BN: N(1, 0.02)
            beta = jnp.zeros((oc,), jnp.float32)
            # GEMM-ready weight: (KH, KW, IC, OC) flattened to (KH*KW*IC, OC); pad
            # very narrow terminal outputs (OC=1) to a lane-dense 128 columns.
            wmat = jnp.transpose(w, (2, 3, 1, 0)).reshape(4 * 4 * ic, oc)
            oc_lane = oc if oc >= 64 else 128
            if oc_lane != oc:
                wmat = jnp.pad(wmat, ((0, 0), (0, oc_lane - oc)))
                b_g = jnp.pad(b, (0, oc_lane - oc))
            else:
                b_g = b
            act = "none" if li == n_layers - 1 else "lrelu"
            self.disc_layers.append(dict(wmat=wmat, bias=b_g, gamma=gamma, beta=beta,
                                         kh=4, kw=4, stride=stride, pad=1,
                                         use_bn=use_bn, act=act, oc=oc, oc_lane=oc_lane))

        # ---- Perceptual loss parameters ----
        # TODO(synk): real LPIPS uses pretrained VGG16 features; deterministic single-layer
        # conv feature extractor is used as a synthetic stand-in (same structural form:
        # conv -> relu -> channel-unit-normalize -> weighted squared diff -> spatial mean).
        key, kf, kl = jax.random.split(key, 3)
        pw = 0.1 * jax.random.normal(kf, (16, 3, 3, 3), jnp.float32)
        self.percep_wmat = jnp.pad(jnp.transpose(pw, (2, 3, 1, 0)).reshape(27, 16),
                                   ((0, 0), (0, 112)))                   # (27, 128) lane-dense
        self.percep_bias = jnp.zeros((128,), jnp.float32)
        self.percep_lin = jnp.pad(jax.random.uniform(kl, (16,), jnp.float32), (0, 112))

    # -------------------- sub-modules --------------------

    def _conv_layer(self, x_nhwc, lyr):
        n = x_nhwc.shape[0]
        patches, oh, ow = _im2col_nhwc(x_nhwc, lyr["kh"], lyr["kw"],
                                       lyr["stride"], lyr["pad"])
        gemm_act = "none" if lyr["use_bn"] else lyr["act"]
        y = _conv_gemm(patches, lyr["wmat"], lyr["bias"], gemm_act)       # (N*OH*OW, OC)
        if lyr["use_bn"]:
            y = _batchnorm_act(y, lyr["gamma"], lyr["beta"], lyr["act"])
        return y.reshape(n, oh, ow, y.shape[1])

    def _discriminator(self, x_nchw):
        y = jnp.transpose(x_nchw.astype(jnp.float32), (0, 2, 3, 1))       # NHWC once
        for lyr in self.disc_layers:
            y = self._conv_layer(y, lyr)
        logits = y[..., :1]                             # drop zero-padded output lanes
        return jnp.transpose(logits, (0, 3, 1, 2))      # (N, 1, H', W') PatchGAN logits

    def _features(self, x_nchw):
        x = jnp.transpose(x_nchw.astype(jnp.float32), (0, 2, 3, 1))
        patches, oh, ow = _im2col_nhwc(x, 3, 3, 1, 1)
        feats = _conv_gemm(patches, self.percep_wmat, self.percep_bias, "relu")
        return feats, x.shape[0] * oh * ow              # (N*H*W, 128), real spatial count

    def _perceptual_loss(self, imgs, imgs_w):
        f1, m = self._features(imgs)
        f2, _ = self._features(imgs_w)
        total = _lpips_distance_sum(f1, f2, self.percep_lin)
        return total / m

    def _mean(self, x):
        s, n = _masked_reduce_sum(_elem_identity, [x])
        return s / n

    def _bce_mean(self, logits, targets):
        s, n = _masked_reduce_sum(_elem_bce, [logits, targets])
        return s / n

    def _hinge_d_loss(self, logits_real, logits_fake):
        sr, nr = _masked_reduce_sum(_elem_hinge_real, [logits_real])
        sf, nf = _masked_reduce_sum(_elem_hinge_fake, [logits_fake])
        return 0.5 * (sr / nr + sf / nf)

    # -------------------- forward --------------------

    def forward(self, inputs, reconstructions, masks, msgs, preds,
                optimizer_idx, global_step, last_layer=None, cond=None, msgs2=None):
        if optimizer_idx == 0:
            weights = [self.percep_weight, self.disc_weight, self.detect_weight]
            losses = []
            losses.append(self._perceptual_loss(imnet_to_lpips(inputs),
                                                imnet_to_lpips(reconstructions)))
            logits_fake = self._discriminator(reconstructions)
            disc_factor = adopt_weight(1.0, global_step,
                                       threshold=self.discriminator_iter_start)  # unused (matches reference)
            losses.append(-self._mean(logits_fake))
            target = jnp.max(masks, axis=1, keepdims=True).astype(jnp.float32)
            detection_loss = self._bce_mean(preds[:, 0:1, :, :], target)
            losses.append(detection_loss)
            if msgs.ndim > 1 and self.decode_weight > 0:
                # TODO(synk): masked_select decoding loss needs dynamic-shape gather; decode_weight
                # defaults to 0.0 so this branch is never taken with reference defaults.
                pass
            if last_layer is not None and self.balanced:
                # TODO(synk): calculate_adaptive_weights uses torch.autograd.grad; would be jax.grad
                # glue (not a Pallas op).  Falling back to static weights.
                scales = weights
            else:
                scales = weights
            total_loss = sum(scales[i] * losses[i] for i in range(len(losses)))
            log = {
                'total_loss': total_loss, 'percep_loss': losses[0], 'percep_scale': scales[0],
                'disc_loss': losses[1], 'disc_scale': scales[1],
                'detect_loss': losses[2], 'detect_scale': scales[2],
                'decode_loss': -1, 'decode_scale': -1,
            }
            return total_loss, log

        if optimizer_idx == 1:
            if cond is not None:
                inputs = jnp.concatenate([inputs, cond], axis=1)
                reconstructions = jnp.concatenate([reconstructions, cond], axis=1)
            # NOTE: real/fake kept as separate discriminator calls so BatchNorm batch
            # statistics match the PyTorch reference (per-call stats).
            logits_real = self._discriminator(inputs)
            logits_fake = self._discriminator(reconstructions)
            disc_factor = adopt_weight(1.0, global_step,
                                       threshold=self.discriminator_iter_start)
            d_loss = disc_factor * self._hinge_d_loss(logits_real, logits_fake)
            log = {'disc_loss': d_loss, 'disc_factor': disc_factor,
                   'logits_real': self._mean(logits_real),
                   'logits_fake': self._mean(logits_fake)}
            return d_loss, log


# ------------------------------------------------------------------
# Demo
# ------------------------------------------------------------------

if __name__ == "__main__":
    key = jax.random.PRNGKey(0)
    k1, k2, k3, k4, k5 = jax.random.split(key, 5)

    N, C, H, W = 2, 3, 32, 32          # spatial 32 so the 5-layer PatchGAN stays valid
    n_msgs, nbits = 2, 8

    inputs = jax.random.normal(k1, (N, C, H, W), jnp.float32)
    reconstructions = jax.random.normal(k2, (N, C, H, W), jnp.float32)
    masks = (jax.random.uniform(k3, (N, n_msgs, H, W)) > 0.5).astype(jnp.float32)
    msgs = (jax.random.uniform(k4, (N, n_msgs, nbits)) > 0.5).astype(jnp.float32)
    preds = jax.random.normal(k5, (N, 1 + nbits, H, W), jnp.float32)

    model = LPIPSWithDiscriminatorPallas()

    total_loss, log0 = model.forward(inputs, reconstructions, masks, msgs, preds,
                                     optimizer_idx=0, global_step=1)
    d_loss, log1 = model.forward(inputs, reconstructions, masks, msgs, preds,
                                 optimizer_idx=1, global_step=1)

    jax.block_until_ready(total_loss)
    jax.block_until_ready(d_loss)
    print("KERNEL_OK")
</pallas_src>

<mosaic_0001>
module attributes {stable_mosaic.version = 11 : i64} {
  func.func @kernel(%arg0: i32, %arg1: i32, %arg2: i32, %arg3: memref<512x27xbf16, #tpu.memory_space<vmem>>, %arg4: memref<27x128xbf16, #tpu.memory_space<vmem>>, %arg5: memref<1x128xf32, #tpu.memory_space<vmem>>, %arg6: memref<512x128xf32, #tpu.memory_space<vmem>>, %arg7: memref<512x128xf32, #tpu.memory_space<vmem>>) attributes {dimension_semantics = [#tpu.dimension_semantics<parallel>, #tpu.dimension_semantics<parallel>, #tpu.dimension_semantics<arbitrary>], iteration_bounds = array<i64: 4, 1, 1>, scalar_prefetch = 0 : i64, scratch_operands = 1 : i64, tpu.core_type = #tpu.core_type<tc>, window_params = [{transform_indices = @transform_0, window_bounds = array<i64: 512, 27>}, {transform_indices = @transform_1, window_bounds = array<i64: 27, 128>}, {transform_indices = @transform_2, window_bounds = array<i64: 1, 128>}, {transform_indices = @transform_3, window_bounds = array<i64: 512, 128>}]} {
    %c0_i32 = arith.constant 0 : i32
    %0 = arith.cmpi eq, %arg2, %c0_i32 : i32
    %1 = arith.extui %0 : i1 to i32
    %c0_i32_0 = arith.constant 0 : i32
    %2 = arith.cmpi ne, %1, %c0_i32_0 : i32
    scf.if %2 {
      %cst_10 = arith.constant 0.000000e+00 : f32
      %12 = vector.broadcast %cst_10 : f32 to vector<512x128xf32>
      %c0_11 = arith.constant 0 : index
      %c0_12 = arith.constant 0 : index
      %13 = vector.load %arg7[%c0_11, %c0_12] : memref<512x128xf32, #tpu.memory_space<vmem>>, vector<512x128xf32>
      tpu.vector_store %arg7[%c0_11, %c0_12], %12 {strides = array<i32>} : memref<512x128xf32, #tpu.memory_space<vmem>>, vector<512x128xf32>,
    } else {
    }
    %c0 = arith.constant 0 : index
    %c0_1 = arith.constant 0 : index
    %3 = vector.load %arg7[%c0, %c0_1] : memref<512x128xf32, #tpu.memory_space<vmem>>, vector<512x128xf32>
    %c0_2 = arith.constant 0 : index
    %c0_3 = arith.constant 0 : index
    %4 = vector.load %arg3[%c0_2, %c0_3] : memref<512x27xbf16, #tpu.memory_space<vmem>>, vector<512x27xbf16>
    %c0_4 = arith.constant 0 : index
    %c0_5 = arith.constant 0 : index
    %5 = vector.load %arg4[%c0_4, %c0_5] : memref<27x128xbf16, #tpu.memory_space<vmem>>, vector<27x128xbf16>
    %cst = arith.constant dense<0.000000e+00> : vector<512x128xf32>
    %6 = tpu.matmul %4, %5, %cst {dimension_numbers = #tpu.dot_dimension_numbers<[1], [0], [0], [1], [0, 0, 1, 1], [], []>} : vector<512x27xbf16>, vector<27x128xbf16>, vector<512x128xf32> -> vector<512x128xf32>
    %7 = arith.addf %3, %6 : vector<512x128xf32>
    %c0_6 = arith.constant 0 : index
    %c0_7 = arith.constant 0 : index
    %8 = vector.load %arg7[%c0_6, %c0_7] : memref<512x128xf32, #tpu.memory_space<vmem>>, vector<512x128xf32>
    tpu.vector_store %arg7[%c0_6, %c0_7], %7 {strides = array<i32>} : memref<512x128xf32, #tpu.memory_space<vmem>>, vector<512x128xf32>,
    %c0_i32_8 = arith.constant 0 : i32
    %9 = arith.cmpi eq, %arg2, %c0_i32_8 : i32
    %10 = arith.extui %9 : i1 to i32
    %c0_i32_9 = arith.constant 0 : i32
    %11 = arith.cmpi ne, %10, %c0_i32_9 : i32
    scf.if %11 {
      %c0_10 = arith.constant 0 : index
      %c0_11 = arith.constant 0 : index
      %12 = vector.load %arg7[%c0_10, %c0_11] : memref<512x128xf32, #tpu.memory_space<vmem>>, vector<512x128xf32>
      %c0_12 = arith.constant 0 : index
      %c0_13 = arith.constant 0 : index
      %13 = vector.load %arg5[%c0_12, %c0_13] : memref<1x128xf32, #tpu.memory_space<vmem>>, vector<1x128xf32>
      %14 = vector.broadcast %13 : vector<1x128xf32> to vector<512x128xf32>
      %15 = arith.addf %12, %14 : vector<512x128xf32>
      %cst_14 = arith.constant 0.000000e+00 : f32
      %16 = vector.broadcast %cst_14 : f32 to vector<512x128xf32>
      %17 = arith.maximumf %15, %16 : vector<512x128xf32>
      %c0_15 = arith.constant 0 : index
      %c0_16 = arith.constant 0 : index
      %18 = vector.load %arg6[%c0_15, %c0_16] : memref<512x128xf32, #tpu.memory_space<vmem>>, vector<512x128xf32>
      tpu.vector_store %arg6[%c0_15, %c0_16], %17 {strides = array<i32>} : memref<512x128xf32, #tpu.memory_space<vmem>>, vector<512x128xf32>,
    } else {
    }
    return
  }
  func.func @transform_0(%arg0: i32, %arg1: i32, %arg2: i32) -> (i32, i32) {
    %c0_i32 = arith.constant 0 : i32
    return %arg0, %arg2 : i32, i32
  }
  func.func @transform_1(%arg0: i32, %arg1: i32, %arg2: i32) -> (i32, i32) {
    %c0_i32 = arith.constant 0 : i32
    return %arg2, %arg1 : i32, i32
  }
  func.func @transform_2(%arg0: i32, %arg1: i32, %arg2: i32) -> (i32, i32) {
    %c0_i32 = arith.constant 0 : i32
    %c0_i32_0 = arith.constant 0 : i32
    return %c0_i32, %arg1 : i32, i32
  }
  func.func @transform_3(%arg0: i32, %arg1: i32, %arg2: i32) -> (i32, i32) {
    %c0_i32 = arith.constant 0 : i32
    return %arg0, %arg1 : i32, i32
  }
}

</mosaic_0001>

<bundles_post_ra>
// kernel: tpu_custom_call.1
= control target key start
LH: loop header
LB: loop body
LE: loop exit
PB: predicated region body
PF: predicated region fallthrough
CT: control target
= control target key end

     0   :  { %8 = vsyncpa [#allocation4], 0  ;;  %s2241_s0 = inlined_call_operand.vmem [shape: bf16[2048,27], index: 0, kind: input, shape index: {}]   ;;  %s2242_s1 = inlined_call_operand.vmem [shape: bf16[27,128], index: 1, kind: input, shape index: {}]   ;;  %s2243_s2 = inlined_call_operand.vmem [shape: f32[1,128], index: 2, kind: input, shape index: {}]   ;;  %s2244_s3 = inlined_call_operand.hbm [shape: f32[2048,128], index: 3, kind: output, shape index: {}]  }
   0x1   :  { %10 = vsyncpa [#allocation4 + $0x1], 0  ;;  %s1916_s12 = smov 0   ;;  %s1918_s13 = smov 0  }
   0x2   :  { %s1920_s14 = smov 0   ;;  %s1922_s15 = smov 0  }
   0x3   :  { %s1924_s16 = smov 0   ;;  %s1926_s17 = smov 0  }
   0x4 LB: > { %s1533_s18 = sadd.s32 4294967295, %s1890_s17   ;;  %s1534_s19 = sadd.s32 4294967294, %s1890_s17   ;;  %s1890_s17 = sphi %s1926_s17, %s16_s17   ;;  %s1886_s16 = sphi %s1924_s16, %s2251_s16   ;;  %s1882_s15 = sphi %s1922_s15, %s2250_s15   ;;  %s1878_s14 = sphi %s1920_s14, %s2249_s14   ;;  %s1874_s13 = sphi %s1918_s13, %s2248_s13   ;;  %s1870_s12 = sphi %s1916_s12, %s2247_s12  }
   0x5   : > { %s35_s20 = sadd.s32 1, %s1886_s16  ;;  %s126_s21 = sadd.s32 1, %s1878_s14 }
   0x6   : > { %p37_p0 = scmp.ge.s32.totalorder %s35_s20, 4  ;;  %p136_p1 = scmp.ne.s32.totalorder %s1878_s14, %s1874_s13 }
   0x7   : > { %p137_p2 = scmp.eq.s32.totalorder %s1533_s18, 3  ;;  %p142_p3 = scmp.ne.s32.totalorder %s1874_s13, %s1870_s12 }
   0x8   : > { %s2253_s20 = smov (%p37_p0, %s35_s20), 0  ;;  %p143_p5 = scmp.eq.s32.totalorder %s1534_s19, 3 }
   0x9   : > { %p1956_p4 = por %p137_p2, %p136_p1  ;;  %s121_s23 = ssub.s32 %s1886_s16, %s2253_s20 }
   0xa   : > { %p1539_p6 = scmp.ge.s32.totalorder %s1890_s17, 1  ;;  %p124_p7 = scmp.eq.s32.totalorder %s121_s23, 0 }
   0xb   : > { %p1963_p8 = por %p143_p5, %p142_p3  ;;  %p191_p9 = scmp.lt.s32.totalorder %s1890_s17, 5 }
   0xc   : > { %s1969_s25 = scalar_select %p124_p7, %s1878_s14, %s126_s21  }
   0xd   : > { %p192_p10 = pnand %p1539_p6, %p191_p9 }
   0xe   : > { %s1541_s28 = sshll.u32 (!%p192_p10), %s1882_s15, 6  ;;  %s226_s8 = sand.u32 (!%p192_p10), 1, %s1874_s13  }
   0xf   : > { %195 = sbr.rel (%p192_p10) target bundleno = 306 (0x132), region = 32  ;;  %p230_p11 = scmp.lt.s32.totalorder (!%p192_p10), %s1541_s28, 255 }
  0x10   : > { %s1540_s11 = sshll.u32 (!%p192_p10), %s226_s8, 9  ;;  %s1615_s19 = sshll.u32 (!%p192_p10), %s1882_s15, 13 }
  0x11   : > { %s2059_s18 = scalar_lea.vmem (!%p192_p10), [#allocation3], %s1540_s11  ;;  %s2186_s27 = scalar_lea.hbm (!%p192_p10), %s2244_s3, %s1615_s19 }
  0x12   : > { %s1425_s21 = sshll.u32 (!%p192_p10), %s2059_s18, 4  ;;  %s2196_s15 = scalar_lea.sflag (!%p192_p10), [#allocation4], %s226_s8  ;;  %s2188_s21 = int_to_ptr.vmem [resolvable:$true] %s1425_s21 }
  0x13   : > { %s1893_s29 = smov (!%p192_p10), [#allocation3]  }
  0x14   : > { %v1780_v0 = vld [vmem:[%s2242_s1 + $0x8] sm:$0x3f]   ;;  %vm720_vm0 = vcmask 1044480   ;;  %vm721_vm1 = vcmask 1045504   ;;  %v1892_v1 = vmov 65535   ;;  %v1781_v5 = vld [vmem:[%s2242_s1] sm:$0xff]  }
  0x15   : > { %v722_v2 = vsel %vm720_vm0, 4294967295, %v1892_v1  ;;  %s2255_s28 = smov (!%p230_p11, %s1541_s28), 255  ;;  %vm623_vm2 = vcmask 220160   ;;  %v2051_v38 = vld [vmem:[%s2243_s2] ss:$0 sm:$0xff]  ;;  %s1818_s30 = sshll.u32 %s1893_s29, 4  ;;  %s1819_s30 = int_to_ptr.vmem [resolvable:$false] %s1818_s30 }
  0x16   : > { %v723_v3 = vsel %vm721_vm1, %v722_v2, 0  ;;  %s1542_s4 = sshll.u32 %s2255_s28, 2  ;;  %s1814_s28 = scalar_lea.vmem %s2188_s21, 8192 }
  0x17   : > { %v725_v4 = vand.u32 %v1780_v0, %v723_v3  ;;  %s1981_s7 = scalar_lea.vmem %s2241_s0, %s1542_s4  ;;  %p1815_p12 = scmp.ne.s32.totalorder %s2188_s21, %s1814_s28 }
  0x18   : > { %v1782_v6 = vld [vmem:[%s1981_s7] sm:$0xff]   ;;  %v1784_v8 = vld [vmem:[%s1981_s7 + $0x8] sm:$0xff]   ;;  %v1786_v10 = vld [vmem:[%s1981_s7 + $0x10] sm:$0xff]   ;;  %s1820_s4 = scalar_lea.vmem %s1819_s30, 16384  ;;  %p1821_p1 = scmp.lt.s32.totalorder %s2188_s21, %s1819_s30 }
  0x19   : > { %1650 = vmatprep.subr.bf16.mxu0 %v725_v4  ;;  %1718 = vmatprep.subr.bf16.mxu1 %v725_v4  ;;  %v1783_v7 = vld [vmem:[%s1981_s7 + $0x80] sm:$0xff]   ;;  %v1785_v9 = vld [vmem:[%s1981_s7 + $0x88] sm:$0xff]   ;;  %v1787_v11 = vld [vmem:[%s1981_s7 + $0x90] sm:$0xff]   ;;  %p1816_p13 = pnand %p1815_p12, %p1956_p4  ;;  %p1822_p2 = scmp.lt.s32.totalorder %s1820_s4, %s1814_s28 }
  0x1a   : > { %1651 = vmatpush3.bf16.msra.mxu0 %v725_v4  ;;  %1720 = vmatpush3.bf16.msra.mxu1 %v725_v4  ;;  %v1788_v12 = vld [vmem:[%s1981_s7 + $0x18] sm:$0xff]   ;;  %v1790_v14 = vld [vmem:[%s1981_s7 + $0x20] sm:$0xff]   ;;  %v1792_v16 = vld [vmem:[%s1981_s7 + $0x28] sm:$0xff]  }
  0x1b   : > { %1652 = vmatprep.subr.bf16.mxu0 %v1781_v5  ;;  %1719 = vmatprep.subr.bf16.mxu1 %v1781_v5  ;;  %v1789_v13 = vld [vmem:[%s1981_s7 + $0x98] sm:$0xff]   ;;  %v1791_v15 = vld [vmem:[%s1981_s7 + $0xa0] sm:$0xff]   ;;  %v1793_v17 = vld [vmem:[%s1981_s7 + $0xa8] sm:$0xff]   ;;  %p1817_p0 = pneg %p1816_p13  ;;  %p1823_p3 = por %p1822_p2, %p1821_p1 }
  0x1c   : > { %1654 = vmatprep.mubr.msk.bf16.mxu0 %vm623_vm2, %v1782_v6  ;;  %1686 = vmatprep.mubr.msk.bf16.mxu1 %vm623_vm2, %v1783_v7  ;;  %v1794_v18 = vld [vmem:[%s1981_s7 + $0x30] sm:$0xff]   ;;  %v1796_v20 = vld [vmem:[%s1981_s7 + $0x38] sm:$0xff]   ;;  %v1798_v22 = vld [vmem:[%s1981_s7 + $0x40] sm:$0xff]  }
  0x1d   : > { %v1795_v19 = vld [vmem:[%s1981_s7 + $0xb0] sm:$0xff]   ;;  %v1797_v21 = vld [vmem:[%s1981_s7 + $0xb8] sm:$0xff]   ;;  %v1799_v23 = vld [vmem:[%s1981_s7 + $0xc0] sm:$0xff]   ;;  %p1824_p5 = pnand %p1823_p3, %p1817_p0 }
  0x1e   : > { %1653 = vmatpush3.bf16.msra.mxu0 %v1781_v5  ;;  %1721 = vmatpush3.bf16.msra.mxu1 %v1781_v5  ;;  %v1800_v24 = vld [vmem:[%s1981_s7 + $0x48] sm:$0xff]   ;;  %v1802_v26 = vld [vmem:[%s1981_s7 + $0x50] sm:$0xff]   ;;  %v1804_v28 = vld [vmem:[%s1981_s7 + $0x58] sm:$0xff]  }
  0x1f   : > { %v1801_v25 = vld [vmem:[%s1981_s7 + $0xc8] sm:$0xff]   ;;  %v1803_v27 = vld [vmem:[%s1981_s7 + $0xd0] sm:$0xff]   ;;  %v1805_v29 = vld [vmem:[%s1981_s7 + $0xd8] sm:$0xff]  }
  0x20   : > { %v1806_v30 = vld [vmem:[%s1981_s7 + $0x60] sm:$0xff]   ;;  %v1808_v32 = vld [vmem:[%s1981_s7 + $0x68] sm:$0xff]   ;;  %v1810_v34 = vld [vmem:[%s1981_s7 + $0x70] sm:$0xff]  }
  0x21   : > { %1655 = vmatmul.mubr.msk.bf16.vlgmr.msra.gmra.mxu0 %vm623_vm2, %v1784_v8  ;;  %1687 = vmatmul.mubr.msk.bf16.vlgmr.msra.gmra.mxu1 %vm623_vm2, %v1785_v9  ;;  %v1807_v31 = vld [vmem:[%s1981_s7 + $0xe0] sm:$0xff]   ;;  %v1809_v33 = vld [vmem:[%s1981_s7 + $0xe8] sm:$0xff]   ;;  %v1811_v35 = vld [vmem:[%s1981_s7 + $0xf0] sm:$0xff]  }
  0x22   : > { %1658 = vmatprep.mubr.msk.bf16.mxu0 %vm623_vm2, %v1786_v10  ;;  %1690 = vmatprep.mubr.msk.bf16.mxu1 %vm623_vm2, %v1787_v11  ;;  %v1812_v36 = vld [vmem:[%s1981_s7 + $0x78] sm:$0xff]  }
  0x23   : > { %v1813_v37 = vld [vmem:[%s1981_s7 + $0xf8] sm:$0xff]  }
  0x29   : > { %1659 = vmatmul.mubr.msk.bf16.gmra.mxu0 %vm623_vm2, %v1788_v12  ;;  %1691 = vmatmul.mubr.msk.bf16.gmra.mxu1 %vm623_vm2, %v1789_v13 }
  0x2a   : > { %1662 = vmatprep.mubr.msk.bf16.mxu0 %vm623_vm2, %v1790_v14  ;;  %1694 = vmatprep.mubr.msk.bf16.mxu1 %vm623_vm2, %v1791_v15 }
  0x31   : > { %1663 = vmatmul.mubr.msk.bf16.gmra.mxu0 %vm623_vm2, %v1792_v16  ;;  %1695 = vmatmul.mubr.msk.bf16.gmra.mxu1 %vm623_vm2, %v1793_v17 }
  0x32   : > { %1666 = vmatprep.mubr.msk.bf16.mxu0 %vm623_vm2, %v1794_v18  ;;  %1698 = vmatprep.mubr.msk.bf16.mxu1 %vm623_vm2, %v1795_v19 }
  0x39   : > { %1667 = vmatmul.mubr.msk.bf16.gmra.mxu0 %vm623_vm2, %v1796_v20  ;;  %1699 = vmatmul.mubr.msk.bf16.gmra.mxu1 %vm623_vm2, %v1797_v21 }
  0x3a   : > { %1670 = vmatprep.mubr.msk.bf16.mxu0 %vm623_vm2, %v1798_v22  ;;  %1702 = vmatprep.mubr.msk.bf16.mxu1 %vm623_vm2, %v1799_v23 }
  0x41   : > { %1671 = vmatmul.mubr.msk.bf16.gmra.mxu0 %vm623_vm2, %v1800_v24  ;;  %1703 = vmatmul.mubr.msk.bf16.gmra.mxu1 %vm623_vm2, %v1801_v25 }
  0x42   : > { %1674 = vmatprep.mubr.msk.bf16.mxu0 %vm623_vm2, %v1802_v26  ;;  %1706 = vmatprep.mubr.msk.bf16.mxu1 %vm623_vm2, %v1803_v27 }
  0x49   : > { %1675 = vmatmul.mubr.msk.bf16.gmra.mxu0 %vm623_vm2, %v1804_v28  ;;  %1707 = vmatmul.mubr.msk.bf16.gmra.mxu1 %vm623_vm2, %v1805_v29 }
  0x4a   : > { %1678 = vmatprep.mubr.msk.bf16.mxu0 %vm623_vm2, %v1806_v30  ;;  %1710 = vmatprep.mubr.msk.bf16.mxu1 %vm623_vm2, %v1807_v31 }
  0x51   : > { %1679 = vmatmul.mubr.msk.bf16.gmra.mxu0 %vm623_vm2, %v1808_v32  ;;  %1711 = vmatmul.mubr.msk.bf16.gmra.mxu1 %vm623_vm2, %v1809_v33 }
  0x52   : > { %1682 = vmatprep.mubr.msk.bf16.mxu0 %vm623_vm2, %v1810_v34  ;;  %1714 = vmatprep.mubr.msk.bf16.mxu1 %vm623_vm2, %v1811_v35 }
  0x59   : > { %1683 = vmatmul.mubr.msk.bf16.gmra.mxu0 %vm623_vm2, %v1812_v36  ;;  %1715 = vmatmul.mubr.msk.bf16.gmra.mxu1 %vm623_vm2, %v1813_v37 }
  0xe1   : > { %v1656_v39 = vpop.f32.mrf.mxu0  ;;  %v1688_v40 = vpop.f32.mrf.mxu1 }
  0xe2   : > { %v1220_v41 = vadd.f32 %v1656_v39, %v2051_v38  ;;  %v1252_v42 = vadd.f32 %v1688_v40, %v2051_v38 }
  0xe3   : > { %v761_v43 = vpop.f32.mrf.mxu0  ;;  %v889_v44 = vpop.f32.mrf.mxu1 }
  0xe4   : > { %v1284_v45 = vmax.f32 %v1220_v41, 0.0  ;;  %v1316_v46 = vmax.f32 %v1252_v42, 0.0  ;;  %v1218_v47 = vadd.f32 %v2051_v38, %v761_v43  ;;  %v1250_v48 = vadd.f32 %v2051_v38, %v889_v44 }
  0xe5   : > { %v1657_v49 = vpop.f32.mrf.mxu0  ;;  %v1689_v50 = vpop.f32.mrf.mxu1 }
  0xe6   : > { %1348 = vst [vmem:[%s2059_s18 + $0x10] sm:$0xff] %v1284_v45  ;;  %1380 = vst [vmem:[%s2059_s18 + $0x110] sm:$0xff] %v1316_v46  ;;  %v1282_v51 = vmax.f32 %v1218_v47, 0.0  ;;  %v1314_v52 = vmax.f32 %v1250_v48, 0.0  ;;  %v1221_v53 = vadd.f32 %v1657_v49, %v2051_v38  ;;  %v1253_v54 = vadd.f32 %v1689_v50, %v2051_v38 }
  0xe7   : > { %v764_v55 = vpop.f32.mrf.mxu0  ;;  %v892_v56 = vpop.f32.mrf.mxu1 }
  0xe8   : > { %1346 = vst [vmem:[%s2059_s18] sm:$0xff] %v1282_v51  ;;  %1378 = vst [vmem:[%s2059_s18 + $0x100] sm:$0xff] %v1314_v52  ;;  %v1285_v57 = vmax.f32 %v1221_v53, 0.0  ;;  %v1317_v58 = vmax.f32 %v1253_v54, 0.0  ;;  %v1219_v59 = vadd.f32 %v2051_v38, %v764_v55  ;;  %v1251_v60 = vadd.f32 %v2051_v38, %v892_v56 }
  0xe9   : > { %v1660_v61 = vpop.f32.mrf.mxu0  ;;  %v1692_v62 = vpop.f32.mrf.mxu1 }
  0xea   : > { %1349 = vst [vmem:[%s2059_s18 + $0x18] sm:$0xff] %v1285_v57  ;;  %1381 = vst [vmem:[%s2059_s18 + $0x118] sm:$0xff] %v1317_v58  ;;  %v1283_v63 = vmax.f32 %v1219_v59, 0.0  ;;  %v1315_v0 = vmax.f32 %v1251_v60, 0.0  ;;  %v1224_v1 = vadd.f32 %v1660_v61, %v2051_v38  ;;  %v1256_v2 = vadd.f32 %v1692_v62, %v2051_v38 }
  0xeb   : > { %v777_v3 = vpop.f32.mrf.mxu0  ;;  %v905_v4 = vpop.f32.mrf.mxu1 }
  0xec   : > { %1347 = vst [vmem:[%s2059_s18 + $0x8] sm:$0xff] %v1283_v63  ;;  %1379 = vst [vmem:[%s2059_s18 + $0x108] sm:$0xff] %v1315_v0  ;;  %v1288_v5 = vmax.f32 %v1224_v1, 0.0  ;;  %v1320_v6 = vmax.f32 %v1256_v2, 0.0  ;;  %v1222_v7 = vadd.f32 %v2051_v38, %v777_v3  ;;  %v1254_v8 = vadd.f32 %v2051_v38, %v905_v4 }
  0xed   : > { %v1661_v9 = vpop.f32.mrf.mxu0  ;;  %v1693_v10 = vpop.f32.mrf.mxu1 }
  0xee   : > { %1352 = vst [vmem:[%s2059_s18 + $0x30] sm:$0xff] %v1288_v5  ;;  %1384 = vst [vmem:[%s2059_s18 + $0x130] sm:$0xff] %v1320_v6  ;;  %v1286_v11 = vmax.f32 %v1222_v7, 0.0  ;;  %v1318_v12 = vmax.f32 %v1254_v8, 0.0  ;;  %v1225_v13 = vadd.f32 %v1661_v9, %v2051_v38  ;;  %v1257_v14 = vadd.f32 %v1693_v10, %v2051_v38 }
  0xef   : > { %v780_v15 = vpop.f32.mrf.mxu0  ;;  %v908_v16 = vpop.f32.mrf.mxu1 }
  0xf0   : > { %1350 = vst [vmem:[%s2059_s18 + $0x20] sm:$0xff] %v1286_v11  ;;  %1382 = vst [vmem:[%s2059_s18 + $0x120] sm:$0xff] %v1318_v12  ;;  %v1289_v17 = vmax.f32 %v1225_v13, 0.0  ;;  %v1321_v18 = vmax.f32 %v1257_v14, 0.0  ;;  %v1223_v19 = vadd.f32 %v2051_v38, %v780_v15  ;;  %v1255_v20 = vadd.f32 %v2051_v38, %v908_v16 }
  0xf1   : > { %v1664_v21 = vpop.f32.mrf.mxu0  ;;  %v1696_v22 = vpop.f32.mrf.mxu1 }
  0xf2   : > { %1353 = vst [vmem:[%s2059_s18 + $0x38] sm:$0xff] %v1289_v17  ;;  %1385 = vst [vmem:[%s2059_s18 + $0x138] sm:$0xff] %v1321_v18  ;;  %v1287_v23 = vmax.f32 %v1223_v19, 0.0  ;;  %v1319_v24 = vmax.f32 %v1255_v20, 0.0  ;;  %v1228_v25 = vadd.f32 %v1664_v21, %v2051_v38  ;;  %v1260_v26 = vadd.f32 %v1696_v22, %v2051_v38 }
  0xf3   : > { %v793_v27 = vpop.f32.mrf.mxu0  ;;  %v921_v28 = vpop.f32.mrf.mxu1 }
  0xf4   : > { %1351 = vst [vmem:[%s2059_s18 + $0x28] sm:$0xff] %v1287_v23  ;;  %1383 = vst [vmem:[%s2059_s18 + $0x128] sm:$0xff] %v1319_v24  ;;  %v1292_v29 = vmax.f32 %v1228_v25, 0.0  ;;  %v1324_v30 = vmax.f32 %v1260_v26, 0.0  ;;  %v1226_v31 = vadd.f32 %v2051_v38, %v793_v27  ;;  %v1258_v32 = vadd.f32 %v2051_v38, %v921_v28 }
  0xf5   : > { %v1665_v33 = vpop.f32.mrf.mxu0  ;;  %v1697_v34 = vpop.f32.mrf.mxu1 }
  0xf6   : > { %1356 = vst [vmem:[%s2059_s18 + $0x50] sm:$0xff] %v1292_v29  ;;  %1388 = vst [vmem:[%s2059_s18 + $0x150] sm:$0xff] %v1324_v30  ;;  %v1290_v35 = vmax.f32 %v1226_v31, 0.0  ;;  %v1322_v36 = vmax.f32 %v1258_v32, 0.0  ;;  %v1229_v37 = vadd.f32 %v1665_v33, %v2051_v38  ;;  %v1261_v39 = vadd.f32 %v1697_v34, %v2051_v38 }
  0xf7   : > { %v796_v40 = vpop.f32.mrf.mxu0  ;;  %v924_v41 = vpop.f32.mrf.mxu1 }
  0xf8   : > { %1354 = vst [vmem:[%s2059_s18 + $0x40] sm:$0xff] %v1290_v35  ;;  %1386 = vst [vmem:[%s2059_s18 + $0x140] sm:$0xff] %v1322_v36  ;;  %v1293_v42 = vmax.f32 %v1229_v37, 0.0  ;;  %v1325_v43 = vmax.f32 %v1261_v39, 0.0  ;;  %v1227_v44 = vadd.f32 %v2051_v38, %v796_v40  ;;  %v1259_v45 = vadd.f32 %v2051_v38, %v924_v41 }
  0xf9   : > { %v1668_v46 = vpop.f32.mrf.mxu0  ;;  %v1700_v47 = vpop.f32.mrf.mxu1 }
  0xfa   : > { %1357 = vst [vmem:[%s2059_s18 + $0x58] sm:$0xff] %v1293_v42  ;;  %1389 = vst [vmem:[%s2059_s18 + $0x158] sm:$0xff] %v1325_v43  ;;  %v1291_v48 = vmax.f32 %v1227_v44, 0.0  ;;  %v1323_v49 = vmax.f32 %v1259_v45, 0.0  ;;  %v1232_v50 = vadd.f32 %v1668_v46, %v2051_v38  ;;  %v1264_v51 = vadd.f32 %v1700_v47, %v2051_v38 }
  0xfb   : > { %v809_v52 = vpop.f32.mrf.mxu0  ;;  %v937_v53 = vpop.f32.mrf.mxu1 }
  0xfc   : > { %1355 = vst [vmem:[%s2059_s18 + $0x48] sm:$0xff] %v1291_v48  ;;  %1387 = vst [vmem:[%s2059_s18 + $0x148] sm:$0xff] %v1323_v49  ;;  %v1296_v54 = vmax.f32 %v1232_v50, 0.0  ;;  %v1328_v55 = vmax.f32 %v1264_v51, 0.0  ;;  %v1230_v56 = vadd.f32 %v2051_v38, %v809_v52  ;;  %v1262_v57 = vadd.f32 %v2051_v38, %v937_v53 }
  0xfd   : > { %v1669_v58 = vpop.f32.mrf.mxu0  ;;  %v1701_v59 = vpop.f32.mrf.mxu1 }
  0xfe   : > { %1360 = vst [vmem:[%s2059_s18 + $0x70] sm:$0xff] %v1296_v54  ;;  %1392 = vst [vmem:[%s2059_s18 + $0x170] sm:$0xff] %v1328_v55  ;;  %v1294_v60 = vmax.f32 %v1230_v56, 0.0  ;;  %v1326_v61 = vmax.f32 %v1262_v57, 0.0  ;;  %v1233_v62 = vadd.f32 %v1669_v58, %v2051_v38  ;;  %v1265_v63 = vadd.f32 %v1701_v59, %v2051_v38 }
  0xff   : > { %v812_v0 = vpop.f32.mrf.mxu0  ;;  %v940_v1 = vpop.f32.mrf.mxu1 }
 0x100   : > { %1358 = vst [vmem:[%s2059_s18 + $0x60] sm:$0xff] %v1294_v60  ;;  %1390 = vst [vmem:[%s2059_s18 + $0x160] sm:$0xff] %v1326_v61  ;;  %v1297_v2 = vmax.f32 %v1233_v62, 0.0  ;;  %v1329_v3 = vmax.f32 %v1265_v63, 0.0  ;;  %v1231_v4 = vadd.f32 %v2051_v38, %v812_v0  ;;  %v1263_v5 = vadd.f32 %v2051_v38, %v940_v1 }
 0x101   : > { %v1672_v6 = vpop.f32.mrf.mxu0  ;;  %v1704_v7 = vpop.f32.mrf.mxu1 }
 0x102   : > { %1361 = vst [vmem:[%s2059_s18 + $0x78] sm:$0xff] %v1297_v2  ;;  %1393 = vst [vmem:[%s2059_s18 + $0x178] sm:$0xff] %v1329_v3  ;;  %v1295_v8 = vmax.f32 %v1231_v4, 0.0  ;;  %v1327_v9 = vmax.f32 %v1263_v5, 0.0  ;;  %v1236_v10 = vadd.f32 %v1672_v6, %v2051_v38  ;;  %v1268_v11 = vadd.f32 %v1704_v7, %v2051_v38 }
 0x103   : > { %v825_v12 = vpop.f32.mrf.mxu0  ;;  %v953_v13 = vpop.f32.mrf.mxu1 }
 0x104   : > { %1359 = vst [vmem:[%s2059_s18 + $0x68] sm:$0xff] %v1295_v8  ;;  %1391 = vst [vmem:[%s2059_s18 + $0x168] sm:$0xff] %v1327_v9  ;;  %v1300_v14 = vmax.f32 %v1236_v10, 0.0  ;;  %v1332_v15 = vmax.f32 %v1268_v11, 0.0  ;;  %v1234_v16 = vadd.f32 %v2051_v38, %v825_v12  ;;  %v1266_v17 = vadd.f32 %v2051_v38, %v953_v13 }
 0x105   : > { %v1673_v18 = vpop.f32.mrf.mxu0  ;;  %v1705_v19 = vpop.f32.mrf.mxu1 }
 0x106   : > { %1364 = vst [vmem:[%s2059_s18 + $0x90] sm:$0xff] %v1300_v14  ;;  %1396 = vst [vmem:[%s2059_s18 + $0x190] sm:$0xff] %v1332_v15  ;;  %v1298_v20 = vmax.f32 %v1234_v16, 0.0  ;;  %v1330_v21 = vmax.f32 %v1266_v17, 0.0  ;;  %v1237_v22 = vadd.f32 %v1673_v18, %v2051_v38  ;;  %v1269_v23 = vadd.f32 %v1705_v19, %v2051_v38 }
 0x107   : > { %v828_v24 = vpop.f32.mrf.mxu0  ;;  %v956_v25 = vpop.f32.mrf.mxu1 }
 0x108   : > { %1362 = vst [vmem:[%s2059_s18 + $0x80] sm:$0xff] %v1298_v20  ;;  %1394 = vst [vmem:[%s2059_s18 + $0x180] sm:$0xff] %v1330_v21  ;;  %v1301_v26 = vmax.f32 %v1237_v22, 0.0  ;;  %v1333_v27 = vmax.f32 %v1269_v23, 0.0  ;;  %v1235_v28 = vadd.f32 %v2051_v38, %v828_v24  ;;  %v1267_v29 = vadd.f32 %v2051_v38, %v956_v25 }
 0x109   : > { %v1676_v30 = vpop.f32.mrf.mxu0  ;;  %v1708_v31 = vpop.f32.mrf.mxu1 }
 0x10a   : > { %1365 = vst [vmem:[%s2059_s18 + $0x98] sm:$0xff] %v1301_v26  ;;  %1397 = vst [vmem:[%s2059_s18 + $0x198] sm:$0xff] %v1333_v27  ;;  %v1299_v32 = vmax.f32 %v1235_v28, 0.0  ;;  %v1331_v33 = vmax.f32 %v1267_v29, 0.0  ;;  %v1240_v34 = vadd.f32 %v1676_v30, %v2051_v38  ;;  %v1272_v35 = vadd.f32 %v1708_v31, %v2051_v38 }
 0x10b   : > { %v841_v36 = vpop.f32.mrf.mxu0  ;;  %v969_v37 = vpop.f32.mrf.mxu1 }
 0x10c   : > { %1363 = vst [vmem:[%s2059_s18 + $0x88] sm:$0xff] %v1299_v32  ;;  %1395 = vst [vmem:[%s2059_s18 + $0x188] sm:$0xff] %v1331_v33  ;;  %v1304_v39 = vmax.f32 %v1240_v34, 0.0  ;;  %v1336_v40 = vmax.f32 %v1272_v35, 0.0  ;;  %v1238_v41 = vadd.f32 %v2051_v38, %v841_v36  ;;  %v1270_v42 = vadd.f32 %v2051_v38, %v969_v37 }
 0x10d   : > { %v1677_v43 = vpop.f32.mrf.mxu0  ;;  %v1709_v44 = vpop.f32.mrf.mxu1 }
 0x10e   : > { %1368 = vst [vmem:[%s2059_s18 + $0xb0] sm:$0xff] %v1304_v39  ;;  %1400 = vst [vmem:[%s2059_s18 + $0x1b0] sm:$0xff] %v1336_v40  ;;  %v1302_v45 = vmax.f32 %v1238_v41, 0.0  ;;  %v1334_v46 = vmax.f32 %v1270_v42, 0.0  ;;  %v1241_v47 = vadd.f32 %v1677_v43, %v2051_v38  ;;  %v1273_v48 = vadd.f32 %v1709_v44, %v2051_v38 }
 0x10f   : > { %v844_v49 = vpop.f32.mrf.mxu0  ;;  %v972_v50 = vpop.f32.mrf.mxu1 }
 0x110   : > { %1366 = vst [vmem:[%s2059_s18 + $0xa0] sm:$0xff] %v1302_v45  ;;  %1398 = vst [vmem:[%s2059_s18 + $0x1a0] sm:$0xff] %v1334_v46  ;;  %v1305_v51 = vmax.f32 %v1241_v47, 0.0  ;;  %v1337_v52 = vmax.f32 %v1273_v48, 0.0  ;;  %v1239_v53 = vadd.f32 %v2051_v38, %v844_v49  ;;  %v1271_v54 = vadd.f32 %v2051_v38, %v972_v50 }
 0x111   : > { %v1680_v55 = vpop.f32.mrf.mxu0  ;;  %v1712_v56 = vpop.f32.mrf.mxu1 }
 0x112   : > { %1369 = vst [vmem:[%s2059_s18 + $0xb8] sm:$0xff] %v1305_v51  ;;  %1401 = vst [vmem:[%s2059_s18 + $0x1b8] sm:$0xff] %v1337_v52  ;;  %v1303_v57 = vmax.f32 %v1239_v53, 0.0  ;;  %v1335_v58 = vmax.f32 %v1271_v54, 0.0  ;;  %v1244_v59 = vadd.f32 %v1680_v55, %v2051_v38  ;;  %v1276_v60 = vadd.f32 %v1712_v56, %v2051_v38 }
 0x113   : > { %v857_v61 = vpop.f32.mrf.mxu0  ;;  %v985_v62 = vpop.f32.mrf.mxu1 }
 0x114   : > { %1367 = vst [vmem:[%s2059_s18 + $0xa8] sm:$0xff] %v1303_v57  ;;  %1399 = vst [vmem:[%s2059_s18 + $0x1a8] sm:$0xff] %v1335_v58  ;;  %v1308_v63 = vmax.f32 %v1244_v59, 0.0  ;;  %v1340_v0 = vmax.f32 %v1276_v60, 0.0  ;;  %v1242_v1 = vadd.f32 %v2051_v38, %v857_v61  ;;  %v1274_v2 = vadd.f32 %v2051_v38, %v985_v62 }
 0x115   : > { %v1681_v3 = vpop.f32.mrf.mxu0  ;;  %v1713_v4 = vpop.f32.mrf.mxu1 }
 0x116   : > { %1372 = vst [vmem:[%s2059_s18 + $0xd0] sm:$0xff] %v1308_v63  ;;  %1404 = vst [vmem:[%s2059_s18 + $0x1d0] sm:$0xff] %v1340_v0  ;;  %v1306_v5 = vmax.f32 %v1242_v1, 0.0  ;;  %v1338_v6 = vmax.f32 %v1274_v2, 0.0  ;;  %v1245_v7 = vadd.f32 %v1681_v3, %v2051_v38  ;;  %v1277_v8 = vadd.f32 %v1713_v4, %v2051_v38 }
 0x117   : > { %v860_v9 = vpop.f32.mrf.mxu0  ;;  %v988_v10 = vpop.f32.mrf.mxu1 }
 0x118   : > { %1370 = vst [vmem:[%s2059_s18 + $0xc0] sm:$0xff] %v1306_v5  ;;  %1402 = vst [vmem:[%s2059_s18 + $0x1c0] sm:$0xff] %v1338_v6  ;;  %v1309_v11 = vmax.f32 %v1245_v7, 0.0  ;;  %v1341_v12 = vmax.f32 %v1277_v8, 0.0  ;;  %v1243_v13 = vadd.f32 %v2051_v38, %v860_v9  ;;  %v1275_v14 = vadd.f32 %v2051_v38, %v988_v10 }
 0x119   : > { %v1684_v15 = vpop.f32.mrf.mxu0  ;;  %v1716_v16 = vpop.f32.mrf.mxu1 }
 0x11a   : > { %1373 = vst [vmem:[%s2059_s18 + $0xd8] sm:$0xff] %v1309_v11  ;;  %1405 = vst [vmem:[%s2059_s18 + $0x1d8] sm:$0xff] %v1341_v12  ;;  %v1307_v17 = vmax.f32 %v1243_v13, 0.0  ;;  %v1339_v18 = vmax.f32 %v1275_v14, 0.0  ;;  %v1248_v19 = vadd.f32 %v1684_v15, %v2051_v38  ;;  %v1280_v20 = vadd.f32 %v1716_v16, %v2051_v38 }
 0x11b   : > { %v873_v21 = vpop.f32.mrf.mxu0  ;;  %v1001_v22 = vpop.f32.mrf.mxu1 }
 0x11c   : > { %1371 = vst [vmem:[%s2059_s18 + $0xc8] sm:$0xff] %v1307_v17  ;;  %1403 = vst [vmem:[%s2059_s18 + $0x1c8] sm:$0xff] %v1339_v18  ;;  %v1312_v23 = vmax.f32 %v1248_v19, 0.0  ;;  %v1344_v24 = vmax.f32 %v1280_v20, 0.0  ;;  %v1246_v25 = vadd.f32 %v2051_v38, %v873_v21  ;;  %v1278_v26 = vadd.f32 %v2051_v38, %v1001_v22 }
 0x11d   : > { %v1685_v27 = vpop.f32.mrf.mxu0  ;;  %v1717_v28 = vpop.f32.mrf.mxu1 }
 0x11e   : > { %1376 = vst [vmem:[%s2059_s18 + $0xf0] sm:$0xff] %v1312_v23  ;;  %1408 = vst [vmem:[%s2059_s18 + $0x1f0] sm:$0xff] %v1344_v24  ;;  %v1310_v29 = vmax.f32 %v1246_v25, 0.0  ;;  %v1342_v30 = vmax.f32 %v1278_v26, 0.0  ;;  %v1249_v31 = vadd.f32 %v1685_v27, %v2051_v38  ;;  %v1281_v32 = vadd.f32 %v1717_v28, %v2051_v38 }
 0x11f   : > { %v876_v33 = vpop.f32.mrf.mxu0  ;;  %v1004_v34 = vpop.f32.mrf.mxu1 }
 0x120   : > { %1374 = vst [vmem:[%s2059_s18 + $0xe0] sm:$0xff] %v1310_v29  ;;  %1406 = vst [vmem:[%s2059_s18 + $0x1e0] sm:$0xff] %v1342_v30  ;;  %v1313_v35 = vmax.f32 %v1249_v31, 0.0  ;;  %v1345_v36 = vmax.f32 %v1281_v32, 0.0  ;;  %v1247_v37 = vadd.f32 %v2051_v38, %v876_v33  ;;  %v1279_v39 = vadd.f32 %v2051_v38, %v1004_v34 }
 0x122   : > { %1377 = vst [vmem:[%s2059_s18 + $0xf8] sm:$0xff] %v1313_v35  ;;  %1409 = vst [vmem:[%s2059_s18 + $0x1f8] sm:$0xff] %v1345_v36  ;;  %v1311_v40 = vmax.f32 %v1247_v37, 0.0  ;;  %v1343_v41 = vmax.f32 %v1279_v39, 0.0 }
 0x124   : > { %1375 = vst [vmem:[%s2059_s18 + $0xe8] sm:$0xff] %v1311_v40  ;;  %1407 = vst [vmem:[%s2059_s18 + $0x1e8] sm:$0xff] %v1343_v41 }
 0x125   : > { %1827 = shalt.err (!%p1824_p5)
}
 0x126   : > { %s1828_s5 = scalar_lea.hbm %s2186_s27, 8192  ;;  %s1832_s8 = scalar_lea.hbm %s2244_s3, 32768 }
 0x127   : > { %p1829_p6 = scmp.ne.s32.totalorder %s2186_s27, %s1828_s5  ;;  %p1833_p10 = scmp.lt.s32.totalorder %s2186_s27, %s2244_s3 }
 0x128   : > { %p1834_p11 = scmp.lt.s32.totalorder %s1832_s8, %s1828_s5 }
 0x129   : > { %p1830_p7 = pnand %p1829_p6, %p1956_p4 }
 0x12a   : > { %p1835_p12 = por %p1834_p11, %p1833_p10 }
 0x12b   : > { %p1831_p9 = pneg %p1830_p7 }
 0x12d   : > { %p1836_p13 = pnand %p1835_p12, %p1831_p9 }
 0x12f   : > { %1839 = shalt.err (!%p1836_p13)
}
 0x130   : > { %s1894_s11 = smov 128   ;;  %s1895_s18 = smov 8  }
 0x131   : > { %1722 = dma.vmem_to_hbm [thread:$0]  (%p1956_p4), %s2188_s21, 8192, %s2186_s27, %s2196_s15, %s1894_s11, %s1894_s11, %s1895_s18  }
 0x132 PF: > { %p1728_p0 = scmp.ge.s32.totalorder %s1890_s17, 2  ;;  %s1440_s19 = sand.u32 1, %s1870_s12  }
 0x133   : > { %s1441_s23 = scalar_lea.sflag [#allocation4], %s1440_s19 }
 0x134   : > { %p1725_p1 = pnand %p1728_p0, %p1963_p8 }
 0x136   : > { %p1726_p2 = pneg %p1725_p1 }
 0x138   : > { %1865 = dma.done.wait (%p1726_p2), %s1441_s23, 8192  }
 0x139   : > { %1867 = vsyncadd (%p1726_p2), %s1441_s23, 4294959104  ;;  %s16_s17 = sadd.s32 1, %s1890_s17   ;;  %s2247_s12 = smov %s1874_s13 }
 0x13a   : > { %p13_p3 = scmp.ge.s32.totalorder %s16_s17, 6   ;;  %s2248_s13 = smov %s1878_s14 }
 0x13b   : > { %s2249_s14 = smov %s1969_s25  ;;  %s2250_s15 = smov %s1886_s16 }
 0x13c   : > { %s2251_s16 = smov %s2253_s20  ;;  %15 = sbr.rel (!%p13_p3) target bundleno = 4 (0x4), region = 81 }
 0x141   :  { %1446 = vsyncpa [#allocation4], 1 }
 0x142   :  { %1448 = vsyncpa [#allocation4 + $0x1], 1 }

</bundles_post_ra>
